<compile_context>
chip_gen: v5e
topology: v5e:2x2
jax: 0.10.0
libtpu: 0.0.40
codegen_flags: <defaults>
</compile_context>

<pallas_src>
import functools

import jax
import jax.numpy as jnp
from jax.experimental import pallas as pl
from jax.experimental.pallas import tpu as pltpu


def _lstm_encoder_kernel(x_ref, wih_ref, whh_ref, b_ref, out_ref,
                         gates_ref, h_ref, c_ref,
                         *, seq_len, batch_p, hidden_size, unroll):
    """Whole-sequence LSTM encoder in one kernel invocation.

    x_ref    : (S*Bp, E)   bf16   time-major flattened embeddings (padded batch)
    wih_ref  : (E, 4H)     bf16   W_ih^T, gate order i, f, g, o
    whh_ref  : (H, 4H)     bf16   W_hh^T
    b_ref    : (1, 4H)     f32    b_ih + b_hh
    out_ref  : (Bp, H)     f32    final hidden state
    gates_ref: (S*Bp, 4H)  f32    VMEM scratch: precomputed input projection
    h_ref    : (Bp, H)     f32    VMEM scratch
    c_ref    : (Bp, H)     f32    VMEM scratch
    """
    H = hidden_size
    Bp = batch_p

    # ---- One big input projection for ALL timesteps (bias folded in once). ----
    gates_ref[...] = (
        jnp.dot(x_ref[...], wih_ref[...], preferred_element_type=jnp.float32)
        + b_ref[...]
    )

    h_ref[...] = jnp.zeros_like(h_ref)
    c_ref[...] = jnp.zeros_like(c_ref)

    # ---- Serial time recurrence: only the (Bp,H)x(H,4H) matmul per step. ----
    def step(t, carry):
        row = pl.multiple_of(t * Bp, Bp)                 # sublane-aligned slice
        g_x = gates_ref[pl.ds(row, Bp), :]               # (Bp, 4H) f32
        h_prev = h_ref[...]
        c_prev = c_ref[...]

        gates = g_x + jnp.dot(h_prev.astype(jnp.bfloat16), whh_ref[...],
                              preferred_element_type=jnp.float32)

        # Full-vreg activations: one sigmoid pass + one tanh pass, then slice.
        sg = jax.nn.sigmoid(gates)                       # (Bp, 4H)
        th = jnp.tanh(gates)                             # (Bp, 4H)
        i_g = sg[:, 0 * H:1 * H]
        f_g = sg[:, 1 * H:2 * H]
        g_g = th[:, 2 * H:3 * H]
        o_g = sg[:, 3 * H:4 * H]

        c_new = f_g * c_prev + i_g * g_g
        h_new = o_g * jnp.tanh(c_new)

        c_ref[...] = c_new
        h_ref[...] = h_new
        return carry

    jax.lax.fori_loop(0, seq_len, step, 0, unroll=unroll)

    # Dropout in eval mode is identity; last_hidden[-1] == h after final step.
    out_ref[...] = h_ref[...].astype(out_ref.dtype)


def encoder_forward(token_ids, emb_table, w_ih, w_hh, b_ih, b_hh):
    """Embedding -> LSTM -> last hidden -> Dropout(eval).

    token_ids : (seq_len, batch) int32   (nn.LSTM default: seq-major)
    emb_table : (vocab, emb)
    w_ih      : (4*hidden, emb)          (PyTorch layout, gates i,f,g,o)
    w_hh      : (4*hidden, hidden)
    b_ih,b_hh : (4*hidden,)
    returns   : (batch, hidden) float32
    """
    seq_len, batch = token_ids.shape
    emb_size = emb_table.shape[1]
    hidden_size = w_hh.shape[1]

    if seq_len == 0:
        # nn.LSTM would reject this; return zero hidden state instead of garbage.
        return jnp.zeros((batch, hidden_size), jnp.float32)

    # Pad batch to a sublane multiple (>= 8) for vreg / MXU row utilization.
    batch_p = max(8, ((batch + 7) // 8) * 8)

    # Glue in plain JAX: embedding gather + parameter layout transforms.
    embeddings = jnp.take(emb_table, token_ids, axis=0)          # (S, B, E) f32
    if batch_p != batch:
        embeddings = jnp.pad(
            embeddings, ((0, 0), (0, batch_p - batch), (0, 0)))  # (S, Bp, E)
    x_flat = embeddings.reshape(seq_len * batch_p, emb_size).astype(jnp.bfloat16)

    wih_t = w_ih.T.astype(jnp.bfloat16)                          # (E, 4H)
    whh_t = w_hh.T.astype(jnp.bfloat16)                          # (H, 4H)
    bias = (b_ih + b_hh).reshape(1, 4 * hidden_size).astype(jnp.float32)

    kernel = functools.partial(
        _lstm_encoder_kernel,
        seq_len=seq_len,
        batch_p=batch_p,
        hidden_size=hidden_size,
        unroll=bool(seq_len <= 32),
    )

    out_padded = pl.pallas_call(
        kernel,
        out_shape=jax.ShapeDtypeStruct((batch_p, hidden_size), jnp.float32),
        grid_spec=pltpu.PrefetchScalarGridSpec(
            num_scalar_prefetch=0,
            grid=(1,),
            in_specs=[
                pl.BlockSpec((seq_len * batch_p, emb_size), lambda i: (0, 0)),
                pl.BlockSpec((emb_size, 4 * hidden_size), lambda i: (0, 0)),
                pl.BlockSpec((hidden_size, 4 * hidden_size), lambda i: (0, 0)),
                pl.BlockSpec((1, 4 * hidden_size), lambda i: (0, 0)),
            ],
            out_specs=pl.BlockSpec((batch_p, hidden_size), lambda i: (0, 0)),
            scratch_shapes=[
                pltpu.VMEM((seq_len * batch_p, 4 * hidden_size), jnp.float32),
                pltpu.VMEM((batch_p, hidden_size), jnp.float32),   # h
                pltpu.VMEM((batch_p, hidden_size), jnp.float32),   # c
            ],
        ),
        compiler_params=pltpu.CompilerParams(
            dimension_semantics=("arbitrary",)),
    )(x_flat, wih_t, whh_t, bias)

    return out_padded[:batch]


if __name__ == "__main__":
    # Small, forward-consistent shapes.
    vocab_size = 50
    emb_size = 16
    hidden_size = 32
    seq_len = 8
    batch = 4

    key = jax.random.PRNGKey(0)
    k_emb, k_ih, k_hh, k_bih, k_bhh, k_tok = jax.random.split(key, 6)

    # Deterministic synthetic parameters (same shapes / init styles as __init__):
    emb_table = jax.random.normal(k_emb, (vocab_size, emb_size), jnp.float32)
    # weight_ih_l0 ~ uniform(-0.01, 0.01)
    w_ih = jax.random.uniform(k_ih, (4 * hidden_size, emb_size),
                              jnp.float32, minval=-0.01, maxval=0.01)
    # weight_hh_l0 ~ orthogonal
    w_hh_raw = jax.random.normal(k_hh, (4 * hidden_size, hidden_size), jnp.float32)
    q, _ = jnp.linalg.qr(w_hh_raw)
    w_hh = q[:, :hidden_size].reshape(4 * hidden_size, hidden_size)
    # LSTM biases keep PyTorch default uniform(-1/sqrt(H), 1/sqrt(H))
    bound = 1.0 / jnp.sqrt(jnp.float32(hidden_size))
    b_ih = jax.random.uniform(k_bih, (4 * hidden_size,), jnp.float32, -bound, bound)
    b_hh = jax.random.uniform(k_bhh, (4 * hidden_size,), jnp.float32, -bound, bound)

    token_ids = jax.random.randint(k_tok, (seq_len, batch), 0, vocab_size,
                                   dtype=jnp.int32)

    out = encoder_forward(token_ids, emb_table, w_ih, w_hh, b_ih, b_hh)
    jax.block_until_ready(out)
    assert out.shape == (batch, hidden_size)
    print("KERNEL_OK")
</pallas_src>

<mosaic_0001>
module attributes {stable_mosaic.version = 11 : i64} {
  func.func @_lstm_encoder_kernel(%arg0: i32, %arg1: memref<64x16xbf16, #tpu.memory_space<vmem>>, %arg2: memref<16x128xbf16, #tpu.memory_space<vmem>>, %arg3: memref<32x128xbf16, #tpu.memory_space<vmem>>, %arg4: memref<1x128xf32, #tpu.memory_space<vmem>>, %arg5: memref<8x32xf32, #tpu.memory_space<vmem>>, %arg6: memref<64x128xf32, #tpu.memory_space<vmem>>, %arg7: memref<8x32xf32, #tpu.memory_space<vmem>>, %arg8: memref<8x32xf32, #tpu.memory_space<vmem>>) attributes {dimension_semantics = [#tpu.dimension_semantics<arbitrary>], iteration_bounds = array<i64: 1>, scalar_prefetch = 0 : i64, scratch_operands = 3 : i64, tpu.core_type = #tpu.core_type<tc>, window_params = [{pipeline_mode = #tpu.pipeline_mode<synchronous>, transform_indices = @transform_0, window_bounds = array<i64: 64, 16>}, {pipeline_mode = #tpu.pipeline_mode<synchronous>, transform_indices = @transform_1, window_bounds = array<i64: 16, 128>}, {pipeline_mode = #tpu.pipeline_mode<synchronous>, transform_indices = @transform_2, window_bounds = array<i64: 32, 128>}, {pipeline_mode = #tpu.pipeline_mode<synchronous>, transform_indices = @transform_3, window_bounds = array<i64: 1, 128>}, {pipeline_mode = #tpu.pipeline_mode<synchronous>, transform_indices = @transform_4, window_bounds = array<i64: 8, 32>}]} {
    %c0 = arith.constant 0 : index
    %c0_0 = arith.constant 0 : index
    %0 = vector.load %arg1[%c0, %c0_0] : memref<64x16xbf16, #tpu.memory_space<vmem>>, vector<64x16xbf16>
    %c0_1 = arith.constant 0 : index
    %c0_2 = arith.constant 0 : index
    %1 = vector.load %arg2[%c0_1, %c0_2] : memref<16x128xbf16, #tpu.memory_space<vmem>>, vector<16x128xbf16>
    %cst = arith.constant dense<0.000000e+00> : vector<64x128xf32>
    %2 = tpu.matmul %0, %1, %cst {dimension_numbers = #tpu.dot_dimension_numbers<[1], [0], [0], [1], [0, 0, 1, 1], [], []>} : vector<64x16xbf16>, vector<16x128xbf16>, vector<64x128xf32> -> vector<64x128xf32>
    %c0_3 = arith.constant 0 : index
    %c0_4 = arith.constant 0 : index
    %3 = vector.load %arg4[%c0_3, %c0_4] : memref<1x128xf32, #tpu.memory_space<vmem>>, vector<1x128xf32>
    %4 = vector.broadcast %3 : vector<1x128xf32> to vector<64x128xf32>
    %5 = arith.addf %2, %4 : vector<64x128xf32>
    %c0_5 = arith.constant 0 : index
    %c0_6 = arith.constant 0 : index
    %6 = vector.load %arg6[%c0_5, %c0_6] : memref<64x128xf32, #tpu.memory_space<vmem>>, vector<64x128xf32>
    tpu.vector_store %arg6[%c0_5, %c0_6], %5 {strides = array<i32>} : memref<64x128xf32, #tpu.memory_space<vmem>>, vector<64x128xf32>,
    %cst_7 = arith.constant 0.000000e+00 : f32
    %7 = vector.broadcast %cst_7 : f32 to vector<8x32xf32>
    %c0_8 = arith.constant 0 : index
    %c0_9 = arith.constant 0 : index
    %8 = vector.load %arg7[%c0_8, %c0_9] : memref<8x32xf32, #tpu.memory_space<vmem>>, vector<8x32xf32>
    tpu.vector_store %arg7[%c0_8, %c0_9], %7 {strides = array<i32>} : memref<8x32xf32, #tpu.memory_space<vmem>>, vector<8x32xf32>,
    %cst_10 = arith.constant 0.000000e+00 : f32
    %9 = vector.broadcast %cst_10 : f32 to vector<8x32xf32>
    %c0_11 = arith.constant 0 : index
    %c0_12 = arith.constant 0 : index
    %10 = vector.load %arg8[%c0_11, %c0_12] : memref<8x32xf32, #tpu.memory_space<vmem>>, vector<8x32xf32>
    tpu.vector_store %arg8[%c0_11, %c0_12], %9 {strides = array<i32>} : memref<8x32xf32, #tpu.memory_space<vmem>>, vector<8x32xf32>,
    %c0_i32 = arith.constant 0 : i32
    %c8_i32 = arith.constant 8 : i32
    %11 = arith.muli %c0_i32, %c8_i32 : i32
    %12 = tpu.assume_multiple %11, 8 : i32
    %13 = arith.index_cast %12 : i32 to index
    %c0_13 = arith.constant 0 : index
    %14 = vector.load %arg6[%13, %c0_13] : memref<64x128xf32, #tpu.memory_space<vmem>>, vector<8x128xf32>
    %c0_14 = arith.constant 0 : index
    %c0_15 = arith.constant 0 : index
    %15 = vector.load %arg7[%c0_14, %c0_15] : memref<8x32xf32, #tpu.memory_space<vmem>>, vector<8x32xf32>
    %c0_16 = arith.constant 0 : index
    %c0_17 = arith.constant 0 : index
    %16 = vector.load %arg8[%c0_16, %c0_17] : memref<8x32xf32, #tpu.memory_space<vmem>>, vector<8x32xf32>
    %17 = arith.truncf %15 : vector<8x32xf32> to vector<8x32xbf16>
    %c0_18 = arith.constant 0 : index
    %c0_19 = arith.constant 0 : index
    %18 = vector.load %arg3[%c0_18, %c0_19] : memref<32x128xbf16, #tpu.memory_space<vmem>>, vector<32x128xbf16>
    %cst_20 = arith.constant dense<0.000000e+00> : vector<8x128xf32>
    %19 = tpu.matmul %17, %18, %cst_20 {dimension_numbers = #tpu.dot_dimension_numbers<[1], [0], [0], [1], [0, 0, 1, 1], [], []>} : vector<8x32xbf16>, vector<32x128xbf16>, vector<8x128xf32> -> vector<8x128xf32>
    %20 = arith.addf %14, %19 : vector<8x128xf32>
    %21 = arith.negf %20 : vector<8x128xf32>
    %22 = math.exp %21 : vector<8x128xf32>
    %cst_21 = arith.constant 1.000000e+00 : f32
    %23 = vector.broadcast %cst_21 : f32 to vector<8x128xf32>
    %24 = arith.addf %23, %22 : vector<8x128xf32>
    %25 = arith.divf %23, %24 : vector<8x128xf32>
    %26 = math.tanh %20 : vector<8x128xf32>
    %27 = vector.extract_strided_slice %25 {offsets = [0, 0], sizes = [8, 32], strides = [1, 1]} : vector<8x128xf32> to vector<8x32xf32>
    %28 = vector.extract_strided_slice %25 {offsets = [0, 32], sizes = [8, 32], strides = [1, 1]} : vector<8x128xf32> to vector<8x32xf32>
    %29 = vector.extract_strided_slice %26 {offsets = [0, 64], sizes = [8, 32], strides = [1, 1]} : vector<8x128xf32> to vector<8x32xf32>
    %30 = vector.extract_strided_slice %25 {offsets = [0, 96], sizes = [8, 32], strides = [1, 1]} : vector<8x128xf32> to vector<8x32xf32>
    %31 = arith.mulf %28, %16 : vector<8x32xf32>
    %32 = arith.mulf %27, %29 : vector<8x32xf32>
    %33 = arith.addf %31, %32 : vector<8x32xf32>
    %34 = math.tanh %33 : vector<8x32xf32>
    %35 = arith.mulf %30, %34 : vector<8x32xf32>
    %c0_22 = arith.constant 0 : index
    %c0_23 = arith.constant 0 : index
    %36 = vector.load %arg8[%c0_22, %c0_23] : memref<8x32xf32, #tpu.memory_space<vmem>>, vector<8x32xf32>
    tpu.vector_store %arg8[%c0_22, %c0_23], %33 {strides = array<i32>} : memref<8x32xf32, #tpu.memory_space<vmem>>, vector<8x32xf32>,
    %c0_24 = arith.constant 0 : index
    %c0_25 = arith.constant 0 : index
    %37 = vector.load %arg7[%c0_24, %c0_25] : memref<8x32xf32, #tpu.memory_space<vmem>>, vector<8x32xf32>
    tpu.vector_store %arg7[%c0_24, %c0_25], %35 {strides = array<i32>} : memref<8x32xf32, #tpu.memory_space<vmem>>, vector<8x32xf32>,
    %c1_i32 = arith.constant 1 : i32
    %c8_i32_26 = arith.constant 8 : i32
    %38 = arith.muli %c1_i32, %c8_i32_26 : i32
    %39 = tpu.assume_multiple %38, 8 : i32
    %40 = arith.index_cast %39 : i32 to index
    %c0_27 = arith.constant 0 : index
    %41 = vector.load %arg6[%40, %c0_27] : memref<64x128xf32, #tpu.memory_space<vmem>>, vector<8x128xf32>
    %c0_28 = arith.constant 0 : index
    %c0_29 = arith.constant 0 : index
    %42 = vector.load %arg7[%c0_28, %c0_29] : memref<8x32xf32, #tpu.memory_space<vmem>>, vector<8x32xf32>
    %c0_30 = arith.constant 0 : index
    %c0_31 = arith.constant 0 : index
    %43 = vector.load %arg8[%c0_30, %c0_31] : memref<8x32xf32, #tpu.memory_space<vmem>>, vector<8x32xf32>
    %44 = arith.truncf %42 : vector<8x32xf32> to vector<8x32xbf16>
    %c0_32 = arith.constant 0 : index
    %c0_33 = arith.constant 0 : index
    %45 = vector.load %arg3[%c0_32, %c0_33] : memref<32x128xbf16, #tpu.memory_space<vmem>>, vector<32x128xbf16>
    %cst_34 = arith.constant dense<0.000000e+00> : vector<8x128xf32>
    %46 = tpu.matmul %44, %45, %cst_34 {dimension_numbers = #tpu.dot_dimension_numbers<[1], [0], [0], [1], [0, 0, 1, 1], [], []>} : vector<8x32xbf16>, vector<32x128xbf16>, vector<8x128xf32> -> vector<8x128xf32>
    %47 = arith.addf %41, %46 : vector<8x128xf32>
    %48 = arith.negf %47 : vector<8x128xf32>
    %49 = math.exp %48 : vector<8x128xf32>
    %cst_35 = arith.constant 1.000000e+00 : f32
    %50 = vector.broadcast %cst_35 : f32 to vector<8x128xf32>
    %51 = arith.addf %50, %49 : vector<8x128xf32>
    %52 = arith.divf %50, %51 : vector<8x128xf32>
    %53 = math.tanh %47 : vector<8x128xf32>
    %54 = vector.extract_strided_slice %52 {offsets = [0, 0], sizes = [8, 32], strides = [1, 1]} : vector<8x128xf32> to vector<8x32xf32>
    %55 = vector.extract_strided_slice %52 {offsets = [0, 32], sizes = [8, 32], strides = [1, 1]} : vector<8x128xf32> to vector<8x32xf32>
    %56 = vector.extract_strided_slice %53 {offsets = [0, 64], sizes = [8, 32], strides = [1, 1]} : vector<8x128xf32> to vector<8x32xf32>
    %57 = vector.extract_strided_slice %52 {offsets = [0, 96], sizes = [8, 32], strides = [1, 1]} : vector<8x128xf32> to vector<8x32xf32>
    %58 = arith.mulf %55, %43 : vector<8x32xf32>
    %59 = arith.mulf %54, %56 : vector<8x32xf32>
    %60 = arith.addf %58, %59 : vector<8x32xf32>
    %61 = math.tanh %60 : vector<8x32xf32>
    %62 = arith.mulf %57, %61 : vector<8x32xf32>
    %c0_36 = arith.constant 0 : index
    %c0_37 = arith.constant 0 : index
    %63 = vector.load %arg8[%c0_36, %c0_37] : memref<8x32xf32, #tpu.memory_space<vmem>>, vector<8x32xf32>
    tpu.vector_store %arg8[%c0_36, %c0_37], %60 {strides = array<i32>} : memref<8x32xf32, #tpu.memory_space<vmem>>, vector<8x32xf32>,
    %c0_38 = arith.constant 0 : index
    %c0_39 = arith.constant 0 : index
    %64 = vector.load %arg7[%c0_38, %c0_39] : memref<8x32xf32, #tpu.memory_space<vmem>>, vector<8x32xf32>
    tpu.vector_store %arg7[%c0_38, %c0_39], %62 {strides = array<i32>} : memref<8x32xf32, #tpu.memory_space<vmem>>, vector<8x32xf32>,
    %c2_i32 = arith.constant 2 : i32
    %c8_i32_40 = arith.constant 8 : i32
    %65 = arith.muli %c2_i32, %c8_i32_40 : i32
    %66 = tpu.assume_multiple %65, 8 : i32
    %67 = arith.index_cast %66 : i32 to index
    %c0_41 = arith.constant 0 : index
    %68 = vector.load %arg6[%67, %c0_41] : memref<64x128xf32, #tpu.memory_space<vmem>>, vector<8x128xf32>
    %c0_42 = arith.constant 0 : index
    %c0_43 = arith.constant 0 : index
    %69 = vector.load %arg7[%c0_42, %c0_43] : memref<8x32xf32, #tpu.memory_space<vmem>>, vector<8x32xf32>
    %c0_44 = arith.constant 0 : index
    %c0_45 = arith.constant 0 : index
    %70 = vector.load %arg8[%c0_44, %c0_45] : memref<8x32xf32, #tpu.memory_space<vmem>>, vector<8x32xf32>
    %71 = arith.truncf %69 : vector<8x32xf32> to vector<8x32xbf16>
    %c0_46 = arith.constant 0 : index
    %c0_47 = arith.constant 0 : index
    %72 = vector.load %arg3[%c0_46, %c0_47] : memref<32x128xbf16, #tpu.memory_space<vmem>>, vector<32x128xbf16>
    %cst_48 = arith.constant dense<0.000000e+00> : vector<8x128xf32>
    %73 = tpu.matmul %71, %72, %cst_48 {dimension_numbers = #tpu.dot_dimension_numbers<[1], [0], [0], [1], [0, 0, 1, 1], [], []>} : vector<8x32xbf16>, vector<32x128xbf16>, vector<8x128xf32> -> vector<8x128xf32>
    %74 = arith.addf %68, %73 : vector<8x128xf32>
    %75 = arith.negf %74 : vector<8x128xf32>
    %76 = math.exp %75 : vector<8x128xf32>
    %cst_49 = arith.constant 1.000000e+00 : f32
    %77 = vector.broadcast %cst_49 : f32 to vector<8x128xf32>
    %78 = arith.addf %77, %76 : vector<8x128xf32>
    %79 = arith.divf %77, %78 : vector<8x128xf32>
    %80 = math.tanh %74 : vector<8x128xf32>
    %81 = vector.extract_strided_slice %79 {offsets = [0, 0], sizes = [8, 32], strides = [1, 1]} : vector<8x128xf32> to vector<8x32xf32>
    %82 = vector.extract_strided_slice %79 {offsets = [0, 32], sizes = [8, 32], strides = [1, 1]} : vector<8x128xf32> to vector<8x32xf32>
    %83 = vector.extract_strided_slice %80 {offsets = [0, 64], sizes = [8, 32], strides = [1, 1]} : vector<8x128xf32> to vector<8x32xf32>
    %84 = vector.extract_strided_slice %79 {offsets = [0, 96], sizes = [8, 32], strides = [1, 1]} : vector<8x128xf32> to vector<8x32xf32>
    %85 = arith.mulf %82, %70 : vector<8x32xf32>
    %86 = arith.mulf %81, %83 : vector<8x32xf32>
    %87 = arith.addf %85, %86 : vector<8x32xf32>
    %88 = math.tanh %87 : vector<8x32xf32>
    %89 = arith.mulf %84, %88 : vector<8x32xf32>
    %c0_50 = arith.constant 0 : index
    %c0_51 = arith.constant 0 : index
    %90 = vector.load %arg8[%c0_50, %c0_51] : memref<8x32xf32, #tpu.memory_space<vmem>>, vector<8x32xf32>
    tpu.vector_store %arg8[%c0_50, %c0_51], %87 {strides = array<i32>} : memref<8x32xf32, #tpu.memory_space<vmem>>, vector<8x32xf32>,
    %c0_52 = arith.constant 0 : index
    %c0_53 = arith.constant 0 : index
    %91 = vector.load %arg7[%c0_52, %c0_53] : memref<8x32xf32, #tpu.memory_space<vmem>>, vector<8x32xf32>
    tpu.vector_store %arg7[%c0_52, %c0_53], %89 {strides = array<i32>} : memref<8x32xf32, #tpu.memory_space<vmem>>, vector<8x32xf32>,
    %c3_i32 = arith.constant 3 : i32
    %c8_i32_54 = arith.constant 8 : i32
    %92 = arith.muli %c3_i32, %c8_i32_54 : i32
    %93 = tpu.assume_multiple %92, 8 : i32
    %94 = arith.index_cast %93 : i32 to index
    %c0_55 = arith.constant 0 : index
    %95 = vector.load %arg6[%94, %c0_55] : memref<64x128xf32, #tpu.memory_space<vmem>>, vector<8x128xf32>
    %c0_56 = arith.constant 0 : index
    %c0_57 = arith.constant 0 : index
    %96 = vector.load %arg7[%c0_56, %c0_57] : memref<8x32xf32, #tpu.memory_space<vmem>>, vector<8x32xf32>
    %c0_58 = arith.constant 0 : index
    %c0_59 = arith.constant 0 : index
    %97 = vector.load %arg8[%c0_58, %c0_59] : memref<8x32xf32, #tpu.memory_space<vmem>>, vector<8x32xf32>
    %98 = arith.truncf %96 : vector<8x32xf32> to vector<8x32xbf16>
    %c0_60 = arith.constant 0 : index
    %c0_61 = arith.constant 0 : index
    %99 = vector.load %arg3[%c0_60, %c0_61] : memref<32x128xbf16, #tpu.memory_space<vmem>>, vector<32x128xbf16>
    %cst_62 = arith.constant dense<0.000000e+00> : vector<8x128xf32>
    %100 = tpu.matmul %98, %99, %cst_62 {dimension_numbers = #tpu.dot_dimension_numbers<[1], [0], [0], [1], [0, 0, 1, 1], [], []>} : vector<8x32xbf16>, vector<32x128xbf16>, vector<8x128xf32> -> vector<8x128xf32>
    %101 = arith.addf %95, %100 : vector<8x128xf32>
    %102 = arith.negf %101 : vector<8x128xf32>
    %103 = math.exp %102 : vector<8x128xf32>
    %cst_63 = arith.constant 1.000000e+00 : f32
    %104 = vector.broadcast %cst_63 : f32 to vector<8x128xf32>
    %105 = arith.addf %104, %103 : vector<8x128xf32>
    %106 = arith.divf %104, %105 : vector<8x128xf32>
    %107 = math.tanh %101 : vector<8x128xf32>
    %108 = vector.extract_strided_slice %106 {offsets = [0, 0], sizes = [8, 32], strides = [1, 1]} : vector<8x128xf32> to vector<8x32xf32>
    %109 = vector.extract_strided_slice %106 {offsets = [0, 32], sizes = [8, 32], strides = [1, 1]} : vector<8x128xf32> to vector<8x32xf32>
    %110 = vector.extract_strided_slice %107 {offsets = [0, 64], sizes = [8, 32], strides = [1, 1]} : vector<8x128xf32> to vector<8x32xf32>
    %111 = vector.extract_strided_slice %106 {offsets = [0, 96], sizes = [8, 32], strides = [1, 1]} : vector<8x128xf32> to vector<8x32xf32>
    %112 = arith.mulf %109, %97 : vector<8x32xf32>
    %113 = arith.mulf %108, %110 : vector<8x32xf32>
    %114 = arith.addf %112, %113 : vector<8x32xf32>
    %115 = math.tanh %114 : vector<8x32xf32>
    %116 = arith.mulf %111, %115 : vector<8x32xf32>
    %c0_64 = arith.constant 0 : index
    %c0_65 = arith.constant 0 : index
    %117 = vector.load %arg8[%c0_64, %c0_65] : memref<8x32xf32, #tpu.memory_space<vmem>>, vector<8x32xf32>
    tpu.vector_store %arg8[%c0_64, %c0_65], %114 {strides = array<i32>} : memref<8x32xf32, #tpu.memory_space<vmem>>, vector<8x32xf32>,
    %c0_66 = arith.constant 0 : index
    %c0_67 = arith.constant 0 : index
    %118 = vector.load %arg7[%c0_66, %c0_67] : memref<8x32xf32, #tpu.memory_space<vmem>>, vector<8x32xf32>
    tpu.vector_store %arg7[%c0_66, %c0_67], %116 {strides = array<i32>} : memref<8x32xf32, #tpu.memory_space<vmem>>, vector<8x32xf32>,
    %c4_i32 = arith.constant 4 : i32
    %c8_i32_68 = arith.constant 8 : i32
    %119 = arith.muli %c4_i32, %c8_i32_68 : i32
    %120 = tpu.assume_multiple %119, 8 : i32
    %121 = arith.index_cast %120 : i32 to index
    %c0_69 = arith.constant 0 : index
    %122 = vector.load %arg6[%121, %c0_69] : memref<64x128xf32, #tpu.memory_space<vmem>>, vector<8x128xf32>
    %c0_70 = arith.constant 0 : index
    %c0_71 = arith.constant 0 : index
    %123 = vector.load %arg7[%c0_70, %c0_71] : memref<8x32xf32, #tpu.memory_space<vmem>>, vector<8x32xf32>
    %c0_72 = arith.constant 0 : index
    %c0_73 = arith.constant 0 : index
    %124 = vector.load %arg8[%c0_72, %c0_73] : memref<8x32xf32, #tpu.memory_space<vmem>>, vector<8x32xf32>
    %125 = arith.truncf %123 : vector<8x32xf32> to vector<8x32xbf16>
    %c0_74 = arith.constant 0 : index
    %c0_75 = arith.constant 0 : index
    %126 = vector.load %arg3[%c0_74, %c0_75] : memref<32x128xbf16, #tpu.memory_space<vmem>>, vector<32x128xbf16>
    %cst_76 = arith.constant dense<0.000000e+00> : vector<8x128xf32>
    %127 = tpu.matmul %125, %126, %cst_76 {dimension_numbers = #tpu.dot_dimension_numbers<[1], [0], [0], [1], [0, 0, 1, 1], [], []>} : vector<8x32xbf16>, vector<32x128xbf16>, vector<8x128xf32> -> vector<8x128xf32>
    %128 = arith.addf %122, %127 : vector<8x128xf32>
    %129 = arith.negf %128 : vector<8x128xf32>
    %130 = math.exp %129 : vector<8x128xf32>
    %cst_77 = arith.constant 1.000000e+00 : f32
    %131 = vector.broadcast %cst_77 : f32 to vector<8x128xf32>
    %132 = arith.addf %131, %130 : vector<8x128xf32>
    %133 = arith.divf %131, %132 : vector<8x128xf32>
    %134 = math.tanh %128 : vector<8x128xf32>
    %135 = vector.extract_strided_slice %133 {offsets = [0, 0], sizes = [8, 32], strides = [1, 1]} : vector<8x128xf32> to vector<8x32xf32>
    %136 = vector.extract_strided_slice %133 {offsets = [0, 32], sizes = [8, 32], strides = [1, 1]} : vector<8x128xf32> to vector<8x32xf32>
    %137 = vector.extract_strided_slice %134 {offsets = [0, 64], sizes = [8, 32], strides = [1, 1]} : vector<8x128xf32> to vector<8x32xf32>
    %138 = vector.extract_strided_slice %133 {offsets = [0, 96], sizes = [8, 32], strides = [1, 1]} : vector<8x128xf32> to vector<8x32xf32>
    %139 = arith.mulf %136, %124 : vector<8x32xf32>
    %140 = arith.mulf %135, %137 : vector<8x32xf32>
    %141 = arith.addf %139, %140 : vector<8x32xf32>
    %142 = math.tanh %141 : vector<8x32xf32>
    %143 = arith.mulf %138, %142 : vector<8x32xf32>
    %c0_78 = arith.constant 0 : index
    %c0_79 = arith.constant 0 : index
    %144 = vector.load %arg8[%c0_78, %c0_79] : memref<8x32xf32, #tpu.memory_space<vmem>>, vector<8x32xf32>
    tpu.vector_store %arg8[%c0_78, %c0_79], %141 {strides = array<i32>} : memref<8x32xf32, #tpu.memory_space<vmem>>, vector<8x32xf32>,
    %c0_80 = arith.constant 0 : index
    %c0_81 = arith.constant 0 : index
    %145 = vector.load %arg7[%c0_80, %c0_81] : memref<8x32xf32, #tpu.memory_space<vmem>>, vector<8x32xf32>
    tpu.vector_store %arg7[%c0_80, %c0_81], %143 {strides = array<i32>} : memref<8x32xf32, #tpu.memory_space<vmem>>, vector<8x32xf32>,
    %c5_i32 = arith.constant 5 : i32
    %c8_i32_82 = arith.constant 8 : i32
    %146 = arith.muli %c5_i32, %c8_i32_82 : i32
    %147 = tpu.assume_multiple %146, 8 : i32
    %148 = arith.index_cast %147 : i32 to index
    %c0_83 = arith.constant 0 : index
    %149 = vector.load %arg6[%148, %c0_83] : memref<64x128xf32, #tpu.memory_space<vmem>>, vector<8x128xf32>
    %c0_84 = arith.constant 0 : index
    %c0_85 = arith.constant 0 : index
    %150 = vector.load %arg7[%c0_84, %c0_85] : memref<8x32xf32, #tpu.memory_space<vmem>>, vector<8x32xf32>
    %c0_86 = arith.constant 0 : index
    %c0_87 = arith.constant 0 : index
    %151 = vector.load %arg8[%c0_86, %c0_87] : memref<8x32xf32, #tpu.memory_space<vmem>>, vector<8x32xf32>
    %152 = arith.truncf %150 : vector<8x32xf32> to vector<8x32xbf16>
    %c0_88 = arith.constant 0 : index
    %c0_89 = arith.constant 0 : index
    %153 = vector.load %arg3[%c0_88, %c0_89] : memref<32x128xbf16, #tpu.memory_space<vmem>>, vector<32x128xbf16>
    %cst_90 = arith.constant dense<0.000000e+00> : vector<8x128xf32>
    %154 = tpu.matmul %152, %153, %cst_90 {dimension_numbers = #tpu.dot_dimension_numbers<[1], [0], [0], [1], [0, 0, 1, 1], [], []>} : vector<8x32xbf16>, vector<32x128xbf16>, vector<8x128xf32> -> vector<8x128xf32>
    %155 = arith.addf %149, %154 : vector<8x128xf32>
    %156 = arith.negf %155 : vector<8x128xf32>
    %157 = math.exp %156 : vector<8x128xf32>
    %cst_91 = arith.constant 1.000000e+00 : f32
    %158 = vector.broadcast %cst_91 : f32 to vector<8x128xf32>
    %159 = arith.addf %158, %157 : vector<8x128xf32>
    %160 = arith.divf %158, %159 : vector<8x128xf32>
    %161 = math.tanh %155 : vector<8x128xf32>
    %162 = vector.extract_strided_slice %160 {offsets = [0, 0], sizes = [8, 32], strides = [1, 1]} : vector<8x128xf32> to vector<8x32xf32>
    %163 = vector.extract_strided_slice %160 {offsets = [0, 32], sizes = [8, 32], strides = [1, 1]} : vector<8x128xf32> to vector<8x32xf32>
    %164 = vector.extract_strided_slice %161 {offsets = [0, 64], sizes = [8, 32], strides = [1, 1]} : vector<8x128xf32> to vector<8x32xf32>
    %165 = vector.extract_strided_slice %160 {offsets = [0, 96], sizes = [8, 32], strides = [1, 1]} : vector<8x128xf32> to vector<8x32xf32>
    %166 = arith.mulf %163, %151 : vector<8x32xf32>
    %167 = arith.mulf %162, %164 : vector<8x32xf32>
    %168 = arith.addf %166, %167 : vector<8x32xf32>
    %169 = math.tanh %168 : vector<8x32xf32>
    %170 = arith.mulf %165, %169 : vector<8x32xf32>
    %c0_92 = arith.constant 0 : index
    %c0_93 = arith.constant 0 : index
    %171 = vector.load %arg8[%c0_92, %c0_93] : memref<8x32xf32, #tpu.memory_space<vmem>>, vector<8x32xf32>
    tpu.vector_store %arg8[%c0_92, %c0_93], %168 {strides = array<i32>} : memref<8x32xf32, #tpu.memory_space<vmem>>, vector<8x32xf32>,
    %c0_94 = arith.constant 0 : index
    %c0_95 = arith.constant 0 : index
    %172 = vector.load %arg7[%c0_94, %c0_95] : memref<8x32xf32, #tpu.memory_space<vmem>>, vector<8x32xf32>
    tpu.vector_store %arg7[%c0_94, %c0_95], %170 {strides = array<i32>} : memref<8x32xf32, #tpu.memory_space<vmem>>, vector<8x32xf32>,
    %c6_i32 = arith.constant 6 : i32
    %c8_i32_96 = arith.constant 8 : i32
    %173 = arith.muli %c6_i32, %c8_i32_96 : i32
    %174 = tpu.assume_multiple %173, 8 : i32
    %175 = arith.index_cast %174 : i32 to index
    %c0_97 = arith.constant 0 : index
    %176 = vector.load %arg6[%175, %c0_97] : memref<64x128xf32, #tpu.memory_space<vmem>>, vector<8x128xf32>
    %c0_98 = arith.constant 0 : index
    %c0_99 = arith.constant 0 : index
    %177 = vector.load %arg7[%c0_98, %c0_99] : memref<8x32xf32, #tpu.memory_space<vmem>>, vector<8x32xf32>
    %c0_100 = arith.constant 0 : index
    %c0_101 = arith.constant 0 : index
    %178 = vector.load %arg8[%c0_100, %c0_101] : memref<8x32xf32, #tpu.memory_space<vmem>>, vector<8x32xf32>
    %179 = arith.truncf %177 : vector<8x32xf32> to vector<8x32xbf16>
    %c0_102 = arith.constant 0 : index
    %c0_103 = arith.constant 0 : index
    %180 = vector.load %arg3[%c0_102, %c0_103] : memref<32x128xbf16, #tpu.memory_space<vmem>>, vector<32x128xbf16>
    %cst_104 = arith.constant dense<0.000000e+00> : vector<8x128xf32>
    %181 = tpu.matmul %179, %180, %cst_104 {dimension_numbers = #tpu.dot_dimension_numbers<[1], [0], [0], [1], [0, 0, 1, 1], [], []>} : vector<8x32xbf16>, vector<32x128xbf16>, vector<8x128xf32> -> vector<8x128xf32>
    %182 = arith.addf %176, %181 : vector<8x128xf32>
    %183 = arith.negf %182 : vector<8x128xf32>
    %184 = math.exp %183 : vector<8x128xf32>
    %cst_105 = arith.constant 1.000000e+00 : f32
    %185 = vector.broadcast %cst_105 : f32 to vector<8x128xf32>
    %186 = arith.addf %185, %184 : vector<8x128xf32>
    %187 = arith.divf %185, %186 : vector<8x128xf32>
    %188 = math.tanh %182 : vector<8x128xf32>
    %189 = vector.extract_strided_slice %187 {offsets = [0, 0], sizes = [8, 32], strides = [1, 1]} : vector<8x128xf32> to vector<8x32xf32>
    %190 = vector.extract_strided_slice %187 {offsets = [0, 32], sizes = [8, 32], strides = [1, 1]} : vector<8x128xf32> to vector<8x32xf32>
    %191 = vector.extract_strided_slice %188 {offsets = [0, 64], sizes = [8, 32], strides = [1, 1]} : vector<8x128xf32> to vector<8x32xf32>
    %192 = vector.extract_strided_slice %187 {offsets = [0, 96], sizes = [8, 32], strides = [1, 1]} : vector<8x128xf32> to vector<8x32xf32>
    %193 = arith.mulf %190, %178 : vector<8x32xf32>
    %194 = arith.mulf %189, %191 : vector<8x32xf32>
    %195 = arith.addf %193, %194 : vector<8x32xf32>
    %196 = math.tanh %195 : vector<8x32xf32>
    %197 = arith.mulf %192, %196 : vector<8x32xf32>
    %c0_106 = arith.constant 0 : index
    %c0_107 = arith.constant 0 : index
    %198 = vector.load %arg8[%c0_106, %c0_107] : memref<8x32xf32, #tpu.memory_space<vmem>>, vector<8x32xf32>
    tpu.vector_store %arg8[%c0_106, %c0_107], %195 {strides = array<i32>} : memref<8x32xf32, #tpu.memory_space<vmem>>, vector<8x32xf32>,
    %c0_108 = arith.constant 0 : index
    %c0_109 = arith.constant 0 : index
    %199 = vector.load %arg7[%c0_108, %c0_109] : memref<8x32xf32, #tpu.memory_space<vmem>>, vector<8x32xf32>
    tpu.vector_store %arg7[%c0_108, %c0_109], %197 {strides = array<i32>} : memref<8x32xf32, #tpu.memory_space<vmem>>, vector<8x32xf32>,
    %c7_i32 = arith.constant 7 : i32
    %c8_i32_110 = arith.constant 8 : i32
    %200 = arith.muli %c7_i32, %c8_i32_110 : i32
    %201 = tpu.assume_multiple %200, 8 : i32
    %202 = arith.index_cast %201 : i32 to index
    %c0_111 = arith.constant 0 : index
    %203 = vector.load %arg6[%202, %c0_111] : memref<64x128xf32, #tpu.memory_space<vmem>>, vector<8x128xf32>
    %c0_112 = arith.constant 0 : index
    %c0_113 = arith.constant 0 : index
    %204 = vector.load %arg7[%c0_112, %c0_113] : memref<8x32xf32, #tpu.memory_space<vmem>>, vector<8x32xf32>
    %c0_114 = arith.constant 0 : index
    %c0_115 = arith.constant 0 : index
    %205 = vector.load %arg8[%c0_114, %c0_115] : memref<8x32xf32, #tpu.memory_space<vmem>>, vector<8x32xf32>
    %206 = arith.truncf %204 : vector<8x32xf32> to vector<8x32xbf16>
    %c0_116 = arith.constant 0 : index
    %c0_117 = arith.constant 0 : index
    %207 = vector.load %arg3[%c0_116, %c0_117] : memref<32x128xbf16, #tpu.memory_space<vmem>>, vector<32x128xbf16>
    %cst_118 = arith.constant dense<0.000000e+00> : vector<8x128xf32>
    %208 = tpu.matmul %206, %207, %cst_118 {dimension_numbers = #tpu.dot_dimension_numbers<[1], [0], [0], [1], [0, 0, 1, 1], [], []>} : vector<8x32xbf16>, vector<32x128xbf16>, vector<8x128xf32> -> vector<8x128xf32>
    %209 = arith.addf %203, %208 : vector<8x128xf32>
    %210 = arith.negf %209 : vector<8x128xf32>
    %211 = math.exp %210 : vector<8x128xf32>
    %cst_119 = arith.constant 1.000000e+00 : f32
    %212 = vector.broadcast %cst_119 : f32 to vector<8x128xf32>
    %213 = arith.addf %212, %211 : vector<8x128xf32>
    %214 = arith.divf %212, %213 : vector<8x128xf32>
    %215 = math.tanh %209 : vector<8x128xf32>
    %216 = vector.extract_strided_slice %214 {offsets = [0, 0], sizes = [8, 32], strides = [1, 1]} : vector<8x128xf32> to vector<8x32xf32>
    %217 = vector.extract_strided_slice %214 {offsets = [0, 32], sizes = [8, 32], strides = [1, 1]} : vector<8x128xf32> to vector<8x32xf32>
    %218 = vector.extract_strided_slice %215 {offsets = [0, 64], sizes = [8, 32], strides = [1, 1]} : vector<8x128xf32> to vector<8x32xf32>
    %219 = vector.extract_strided_slice %214 {offsets = [0, 96], sizes = [8, 32], strides = [1, 1]} : vector<8x128xf32> to vector<8x32xf32>
    %220 = arith.mulf %217, %205 : vector<8x32xf32>
    %221 = arith.mulf %216, %218 : vector<8x32xf32>
    %222 = arith.addf %220, %221 : vector<8x32xf32>
    %223 = math.tanh %222 : vector<8x32xf32>
    %224 = arith.mulf %219, %223 : vector<8x32xf32>
    %c0_120 = arith.constant 0 : index
    %c0_121 = arith.constant 0 : index
    %225 = vector.load %arg8[%c0_120, %c0_121] : memref<8x32xf32, #tpu.memory_space<vmem>>, vector<8x32xf32>
    tpu.vector_store %arg8[%c0_120, %c0_121], %222 {strides = array<i32>} : memref<8x32xf32, #tpu.memory_space<vmem>>, vector<8x32xf32>,
    %c0_122 = arith.constant 0 : index
    %c0_123 = arith.constant 0 : index
    %226 = vector.load %arg7[%c0_122, %c0_123] : memref<8x32xf32, #tpu.memory_space<vmem>>, vector<8x32xf32>
    tpu.vector_store %arg7[%c0_122, %c0_123], %224 {strides = array<i32>} : memref<8x32xf32, #tpu.memory_space<vmem>>, vector<8x32xf32>,
    %c8_i32_124 = arith.constant 8 : i32
    %c0_125 = arith.constant 0 : index
    %c0_126 = arith.constant 0 : index
    %227 = vector.load %arg7[%c0_125, %c0_126] : memref<8x32xf32, #tpu.memory_space<vmem>>, vector<8x32xf32>
    %c0_127 = arith.constant 0 : index
    %c0_128 = arith.constant 0 : index
    %228 = vector.load %arg5[%c0_127, %c0_128] : memref<8x32xf32, #tpu.memory_space<vmem>>, vector<8x32xf32>
    tpu.vector_store %arg5[%c0_127, %c0_128], %227 {strides = array<i32>} : memref<8x32xf32, #tpu.memory_space<vmem>>, vector<8x32xf32>,
    return
  }
  func.func @transform_0(%arg0: i32) -> (i32, i32) {
    %c0_i32 = arith.constant 0 : i32
    %c0_i32_0 = arith.constant 0 : i32
    %c0_i32_1 = arith.constant 0 : i32
    return %c0_i32, %c0_i32_0 : i32, i32
  }
  func.func @transform_1(%arg0: i32) -> (i32, i32) {
    %c0_i32 = arith.constant 0 : i32
    %c0_i32_0 = arith.constant 0 : i32
    %c0_i32_1 = arith.constant 0 : i32
    return %c0_i32, %c0_i32_0 : i32, i32
  }
  func.func @transform_2(%arg0: i32) -> (i32, i32) {
    %c0_i32 = arith.constant 0 : i32
    %c0_i32_0 = arith.constant 0 : i32
    %c0_i32_1 = arith.constant 0 : i32
    return %c0_i32, %c0_i32_0 : i32, i32
  }
  func.func @transform_3(%arg0: i32) -> (i32, i32) {
    %c0_i32 = arith.constant 0 : i32
    %c0_i32_0 = arith.constant 0 : i32
    %c0_i32_1 = arith.constant 0 : i32
    return %c0_i32, %c0_i32_0 : i32, i32
  }
  func.func @transform_4(%arg0: i32) -> (i32, i32) {
    %c0_i32 = arith.constant 0 : i32
    %c0_i32_0 = arith.constant 0 : i32
    %c0_i32_1 = arith.constant 0 : i32
    return %c0_i32, %c0_i32_0 : i32, i32
  }
}

</mosaic_0001>

<bundles_post_ra>
// kernel: tpu_custom_call.1
= control target key start
LH: loop header
LB: loop body
LE: loop exit
PB: predicated region body
PF: predicated region fallthrough
CT: control target
= control target key end

     0   :  { %vm109_vm0 = vcmask 261120   ;;  %v1062_v3 = vmov 0.0   ;;  %vm59_vm1 = vcmask 130048   ;;  %s1250_s0 = inlined_call_operand.vmem [shape: bf16[64,16], index: 0, kind: input, shape index: {}]   ;;  %s1251_s1 = inlined_call_operand.vmem [shape: bf16[16,128], index: 1, kind: input, shape index: {}]   ;;  %s1252_s2 = inlined_call_operand.vmem [shape: bf16[32,128], index: 2, kind: input, shape index: {}]   ;;  %s1253_s3 = inlined_call_operand.vmem [shape: f32[1,128], index: 3, kind: input, shape index: {}]   ;;  %s1254_s4 = inlined_call_operand.hbm [shape: f32[8,32], index: 4, kind: output, shape index: {}]  }
   0x1   :  { %v949_v0 = vld [vmem:[%s1251_s1] sm:$0xff]  ;;  %v951_v1 = vld [vmem:[%s1252_s2 + $0x8] sm:$0xff]  ;;  %110 = vst.msk [vmem:[#allocation3] sm:$0xff] %vm109_vm0, %v1062_v3 }
   0x2   :  { %v945_v2 = vld [vmem:[%s1250_s0] sm:$0xff]  ;;  %79 = vmatpush.bf16.msra.mxu0 %v949_v0  ;;  %141 = vmatpush.bf16.msra.mxu1 %v951_v1  ;;  %111 = vst.msk [vmem:[#allocation4] sm:$0xff] %vm109_vm0, %v1062_v3 }
   0x3   :  { %v950_v4 = vld [vmem:[%s1252_s2] sm:$0xff] }
   0x4   :  { %9 = vsyncpa [#allocation6], 0  ;;  %v1111_v7 = vld [vmem:[%s1253_s3] ss:$0 sm:$0xff]  ;;  %s1063_s24 = smov 64   ;;  %s1064_s25 = smov 32  }
   0x5   :  { %861 = vmatmul.msk.bf16.vlgmr.msra.gmra.mxu0 %vm59_vm1, %v945_v2  ;;  %s1065_s3 = smov 96   ;;  %v953_v37 = vld [vmem:[%s1252_s2 + $0x8] sm:$0xff]  ;;  %v952_v38 = vld [vmem:[%s1252_s2] sm:$0xff]  ;;  %s832_s11 = sshll.u32 %s1254_s4, 4  ;;  %s833_s11 = int_to_ptr.hbm [resolvable:$true] %s832_s11 }
   0x6   :  { %142 = vmatpush.bf16.msra.mxu1 %v950_v4  ;;  %230 = vmatpush.bf16.msra.mxu2 %v953_v37 }
   0x8   :  { %v113_v5 = vld [vmem:[#allocation3] sm:$0xff] }
   0x9   :  { %v115_v6 = vpack.c.bf16 %v113_v5, %v113_v5  ;;  %v114_v14 = vld [vmem:[#allocation4] sm:$0xff] }
   0xa   :  { %231 = vmatpush.bf16.msra.mxu2 %v952_v38 }
   0xb   :  { %873 = vmatmul.msk.bf16.vlgmr.msra.gmra.mxu1 %vm109_vm0, %v115_v6 }
  0x82   :  { %v81_v8 = vpop.f32.mrf.mxu0 }
  0x83   :  { %v82_v9 = vadd.f32 %v1111_v7, %v81_v8 }
  0x88   :  { %v144_v10 = vpop.f32.mrf.mxu1 }
  0x89   :  { %v148_v11 = vadd.f32 %v144_v10, %v82_v9 }
  0x8a   :  { %v83_v44 = vpop.f32.mrf.mxu0 }
  0x8b   :  { %972 = vtanh.f32 %v148_v11  ;;  %v874_v15 = vmul.f32 -1.442695, %v148_v11  ;;  %v84_v45 = vadd.f32 %v1111_v7, %v83_v44  ;;  %v955_v11 = vld [vmem:[%s1252_s2 + $0x8] sm:$0xff] }
  0x8c   :  { %319 = vmatpush.bf16.msra.mxu3 %v955_v11  ;;  %v957_v44 = vld [vmem:[%s1252_s2 + $0x8] sm:$0xff] }
  0x8d   :  { %974 = vpow2.f32 %v874_v15  ;;  %408 = vmatpush.bf16.msrb.mxu1 %v957_v44 }
  0x90   :  { %v146_v12 = vpop.f32.mrf.mxu1 }
  0x91   :  { %v973_v13 = vpop.eup %972  ;;  %v946_v12 = vld [vmem:[%s1250_s0 + $0x8] sm:$0xff] }
  0x92   :  { %175 = vrot.lane.b32.xlu0 %v973_v13, %s1063_s24  ;;  %862 = vmatmul.msk.bf16.gmra.mxu0 %vm59_vm1, %v946_v12  ;;  %v954_v13 = vld [vmem:[%s1252_s2] sm:$0xff] }
  0x93   :  { %v975_v16 = vpop.eup %974  ;;  %320 = vmatpush.bf16.msra.mxu3 %v954_v13 }
  0x94   :  { %v152_v17 = vadd.f32 1.0, %v975_v16 }
  0x96   :  { %976 = vrcp.f32 %v152_v17  ;;  %v164_v23 = vand.u32 2147483648, %v152_v17  ;;  %vm158_vm3 = vweird.f32 %v152_v17  ;;  %v162_v24 = vand.u32 2147483647, %v152_v17 }
  0x98   :  { %v165_v26 = vor.u32 1.1754944e-38, %v164_v23  ;;  %vm163_vm5 = vcmp.eq.f32.partialorder %v162_v24, 8.507059e+37 }
  0x9a   :  { %170 = vrot.lane.b32.xlu0 %v114_v14, %s1064_s25 }
  0x9c   :  { %v977_v18 = vpop.eup %976 }
  0x9d   :  { %v154_v19 = vmul.f32 %v977_v18, %v152_v17  ;;  %vm159_vm2 = vweird.f32 %v977_v18 }
  0x9e   :  { %vm160_vm4 = vmor %vm158_vm3, %vm159_vm2 }
  0x9f   :  { %v155_v20 = vsub.f32 1.0, %v154_v19 }
  0xa1   :  { %v156_v21 = vmul.f32 %v977_v18, %v155_v20 }
  0xa3   :  { %v157_v22 = vadd.f32 %v977_v18, %v156_v21 }
  0xa5   :  { %v161_v25 = vsel %vm160_vm4, %v977_v18, %v157_v22 }
  0xa6   :  { %v166_v28 = vsel %vm163_vm5, %v165_v26, %v161_v25 }
 0x104   :  { %v176_v27 = vpop.permute.xlu0 %175 }
 0x105   :  { %v178_v29 = vmul.f32 %v176_v27, %v166_v28 }
 0x107   :  { %180 = vrot.lane.b32.xlu1 %v178_v29, %s1064_s25 }
 0x10c   :  { %v171_v30 = vpop.permute.xlu0 %170 }
 0x10d   :  { %v173_v31 = vmul.f32 %v171_v30, %v166_v28 }
 0x10f   :  { %v86_v17 = vpop.f32.mrf.mxu0 }
 0x110   :  { %v87_v18 = vadd.f32 %v1111_v7, %v86_v17 }
 0x179   :  { %v181_v32 = vpop.permute.xlu1 %180 }
 0x17a   :  { %v183_v33 = vadd.f32 %v181_v32, %v173_v31 }
 0x17c   :  { %978 = vtanh.f32 %v183_v33 }
 0x182   :  { %v979_v34 = vpop.eup %978 }
 0x183   :  { %186 = vrot.lane.b32.xlu1 %v979_v34, %s1063_s24 }
 0x1f5   :  { %v187_v35 = vpop.permute.xlu1 %186 }
 0x1f6   :  { %v189_v36 = vmul.f32 %v187_v35, %v166_v28 }
 0x1f8   :  { %196 = vrot.lane.b32.xlu2 %v189_v36, %s1064_s25 }
 0x200   :  { %191 = vrot.lane.b32.xlu2 %v183_v33, %s1065_s3 }
 0x252   :  { %v197_v39 = vpop.permute.xlu2 %196 }
 0x253   :  { %199 = vst.msk [vmem:[#allocation3] sm:$0xff] %vm109_vm0, %v197_v39 }
 0x25a   :  { %v192_v40 = vpop.permute.xlu2 %191  ;;  %v202_v41 = vld [vmem:[#allocation3] sm:$0xff] }
 0x25b   :  { %194 = vst.msk [vmem:[#allocation4] sm:$0xff] %vm109_vm0, %v192_v40  ;;  %v204_v42 = vpack.c.bf16 %v202_v41, %v202_v41 }
 0x25d   :  { %883 = vmatmul.msk.bf16.vlgmr.msra.gmra.mxu2 %vm109_vm0, %v204_v42 }
 0x262   :  { %v203_v43 = vld [vmem:[#allocation4] sm:$0xff] }
 0x263   :  { %259 = vrot.lane.b32.xlu1 %v203_v43, %s1064_s25 }
 0x2d5   :  { %v260_v1 = vpop.permute.xlu1 %259 }
 0x2e0   :  { %v233_v46 = vpop.f32.mrf.mxu2 }
 0x2e1   :  { %v237_v47 = vadd.f32 %v233_v46, %v84_v45 }
 0x2e3   :  { %980 = vtanh.f32 %v237_v47  ;;  %v884_v50 = vmul.f32 -1.442695, %v237_v47 }
 0x2e5   :  { %982 = vpow2.f32 %v884_v50 }
 0x2e8   :  { %v235_v48 = vpop.f32.mrf.mxu2 }
 0x2e9   :  { %v981_v49 = vpop.eup %980  ;;  %v956_v48 = vld [vmem:[%s1252_s2] sm:$0xff] }
 0x2ea   :  { %264 = vrot.lane.b32.xlu0 %v981_v49, %s1063_s24  ;;  %409 = vmatpush.bf16.msrb.mxu1 %v956_v48 }
 0x2eb   :  { %v983_v51 = vpop.eup %982 }
 0x2ec   :  { %v241_v52 = vadd.f32 1.0, %v983_v51 }
 0x2ee   :  { %984 = vrcp.f32 %v241_v52  ;;  %v253_v58 = vand.u32 2147483648, %v241_v52  ;;  %vm247_vm7 = vweird.f32 %v241_v52  ;;  %v251_v59 = vand.u32 2147483647, %v241_v52 }
 0x2f0   :  { %v254_v61 = vor.u32 1.1754944e-38, %v253_v58  ;;  %vm252_vm9 = vcmp.eq.f32.partialorder %v251_v59, 8.507059e+37 }
 0x2f4   :  { %v985_v53 = vpop.eup %984 }
 0x2f5   :  { %v243_v54 = vmul.f32 %v985_v53, %v241_v52  ;;  %vm248_vm6 = vweird.f32 %v985_v53  ;;  %v88_v52 = vpop.f32.mrf.mxu0 }
 0x2f6   :  { %vm249_vm8 = vmor %vm247_vm7, %vm248_vm6 }
 0x2f7   :  { %v244_v55 = vsub.f32 1.0, %v243_v54 }
 0x2f9   :  { %v245_v56 = vmul.f32 %v985_v53, %v244_v55 }
 0x2fb   :  { %v246_v57 = vadd.f32 %v985_v53, %v245_v56 }
 0x2fd   :  { %v250_v60 = vsel %vm249_vm8, %v985_v53, %v246_v57  ;;  %v89_v53 = vadd.f32 %v1111_v7, %v88_v52  ;;  %v961_v52 = vld [vmem:[%s1252_s2 + $0x8] sm:$0xff] }
 0x2fe   :  { %v255_v63 = vsel %vm252_vm9, %v254_v61, %v250_v60  ;;  %586 = vmatpush.bf16.msrb.mxu3 %v961_v52 }
 0x2ff   :  { %v262_v2 = vmul.f32 %v260_v1, %v255_v63 }
 0x35c   :  { %v265_v62 = vpop.permute.xlu0 %264 }
 0x35d   :  { %v267_v0 = vmul.f32 %v265_v62, %v255_v63 }
 0x35f   :  { %269 = vrot.lane.b32.xlu2 %v267_v0, %s1064_s25 }
 0x3b9   :  { %v270_v3 = vpop.permute.xlu2 %269 }
 0x3ba   :  { %v272_v4 = vadd.f32 %v270_v3, %v262_v2 }
 0x3bc   :  { %986 = vtanh.f32 %v272_v4  ;;  %280 = vrot.lane.b32.xlu2 %v272_v4, %s1065_s3 }
 0x3c2   :  { %v987_v5 = vpop.eup %986 }
 0x3c3   :  { %275 = vrot.lane.b32.xlu0 %v987_v5, %s1063_s24 }
 0x416   :  { %v281_v6 = vpop.permute.xlu2 %280 }
 0x417   :  { %283 = vst.msk [vmem:[#allocation4] sm:$0xff] %vm109_vm0, %v281_v6 }
 0x41e   :  { %v292_v10 = vld [vmem:[#allocation4] sm:$0xff] }
 0x435   :  { %v276_v8 = vpop.permute.xlu0 %275 }
 0x436   :  { %v278_v9 = vmul.f32 %v276_v8, %v255_v63 }
 0x438   :  { %285 = vrot.lane.b32.xlu1 %v278_v9, %s1064_s25 }
 0x440   :  { %348 = vrot.lane.b32.xlu1 %v292_v10, %s1064_s25 }
 0x4aa   :  { %v286_v14 = vpop.permute.xlu1 %285 }
 0x4ab   :  { %288 = vst.msk [vmem:[#allocation3] sm:$0xff] %vm109_vm0, %v286_v14 }
 0x4b2   :  { %v291_v15 = vld [vmem:[#allocation3] sm:$0xff]  ;;  %v349_v38 = vpop.permute.xlu1 %348 }
 0x4b3   :  { %v293_v16 = vpack.c.bf16 %v291_v15, %v291_v15 }
 0x4b5   :  { %893 = vmatmul.msk.bf16.vlgmr.msra.gmra.mxu3 %vm109_vm0, %v293_v16  ;;  %v959_v16 = vld [vmem:[%s1252_s2 + $0x8] sm:$0xff] }
 0x4b6   :  { %497 = vmatpush.bf16.msrb.mxu2 %v959_v16 }
 0x538   :  { %v322_v19 = vpop.f32.mrf.mxu3 }
 0x539   :  { %v326_v20 = vadd.f32 %v322_v19, %v87_v18 }
 0x53b   :  { %988 = vtanh.f32 %v326_v20  ;;  %v894_v23 = vmul.f32 -1.442695, %v326_v20  ;;  %v958_v20 = vld [vmem:[%s1252_s2] sm:$0xff] }
 0x53c   :  { %498 = vmatpush.bf16.msrb.mxu2 %v958_v20 }
 0x53d   :  { %990 = vpow2.f32 %v894_v23 }
 0x540   :  { %v324_v21 = vpop.f32.mrf.mxu3 }
 0x541   :  { %v989_v22 = vpop.eup %988  ;;  %v947_v21 = vld [vmem:[%s1250_s0 + $0x10] sm:$0xff] }
 0x542   :  { %353 = vrot.lane.b32.xlu0 %v989_v22, %s1063_s24  ;;  %863 = vmatmul.msk.bf16.gmra.mxu0 %vm59_vm1, %v947_v21 }
 0x543   :  { %v991_v24 = vpop.eup %990 }
 0x544   :  { %v330_v25 = vadd.f32 1.0, %v991_v24 }
 0x546   :  { %992 = vrcp.f32 %v330_v25  ;;  %v342_v31 = vand.u32 2147483648, %v330_v25  ;;  %vm336_vm11 = vweird.f32 %v330_v25  ;;  %v340_v32 = vand.u32 2147483647, %v330_v25 }
 0x548   :  { %v343_v34 = vor.u32 1.1754944e-38, %v342_v31  ;;  %vm341_vm13 = vcmp.eq.f32.partialorder %v340_v32, 8.507059e+37 }
 0x54c   :  { %v993_v26 = vpop.eup %992 }
 0x54d   :  { %v332_v27 = vmul.f32 %v993_v26, %v330_v25  ;;  %vm337_vm10 = vweird.f32 %v993_v26 }
 0x54e   :  { %vm338_vm12 = vmor %vm336_vm11, %vm337_vm10 }
 0x54f   :  { %v333_v28 = vsub.f32 1.0, %v332_v27 }
 0x551   :  { %v334_v29 = vmul.f32 %v993_v26, %v333_v28 }
 0x553   :  { %v335_v30 = vadd.f32 %v993_v26, %v334_v29 }
 0x555   :  { %v339_v33 = vsel %vm338_vm12, %v993_v26, %v335_v30 }
 0x556   :  { %v344_v36 = vsel %vm341_vm13, %v343_v34, %v339_v33 }
 0x557   :  { %v351_v39 = vmul.f32 %v349_v38, %v344_v36 }
 0x5b4   :  { %v354_v35 = vpop.permute.xlu0 %353 }
 0x5b5   :  { %v356_v37 = vmul.f32 %v354_v35, %v344_v36 }
 0x5b7   :  { %358 = vrot.lane.b32.xlu2 %v356_v37, %s1064_s25 }
 0x5bf   :  { %v91_v25 = vpop.f32.mrf.mxu0 }
 0x5c0   :  { %v92_v26 = vadd.f32 %v1111_v7, %v91_v25 }
 0x611   :  { %v359_v40 = vpop.permute.xlu2 %358 }
 0x612   :  { %v361_v41 = vadd.f32 %v359_v40, %v351_v39 }
 0x614   :  { %994 = vtanh.f32 %v361_v41  ;;  %369 = vrot.lane.b32.xlu2 %v361_v41, %s1065_s3 }
 0x61a   :  { %v995_v42 = vpop.eup %994 }
 0x61b   :  { %364 = vrot.lane.b32.xlu0 %v995_v42, %s1063_s24 }
 0x66e   :  { %v370_v43 = vpop.permute.xlu2 %369 }
 0x66f   :  { %372 = vst.msk [vmem:[#allocation4] sm:$0xff] %vm109_vm0, %v370_v43 }
 0x676   :  { %v381_v47 = vld [vmem:[#allocation4] sm:$0xff] }
 0x68d   :  { %v365_v45 = vpop.permute.xlu0 %364 }
 0x68e   :  { %v367_v46 = vmul.f32 %v365_v45, %v344_v36 }
 0x690   :  { %374 = vrot.lane.b32.xlu1 %v367_v46, %s1064_s25 }
 0x698   :  { %437 = vrot.lane.b32.xlu1 %v381_v47, %s1064_s25 }
 0x702   :  { %v375_v49 = vpop.permute.xlu1 %374 }
 0x703   :  { %377 = vst.msk [vmem:[#allocation3] sm:$0xff] %vm109_vm0, %v375_v49 }
 0x70a   :  { %v380_v50 = vld [vmem:[#allocation3] sm:$0xff]  ;;  %v438_v10 = vpop.permute.xlu1 %437 }
 0x70b   :  { %v382_v51 = vpack.c.bf16 %v380_v50, %v380_v50 }
 0x70d   :  { %903 = vmatmul.msk.bf16.vlgmr.msrb.gmra.mxu1 %vm109_vm0, %v382_v51 }
 0x78a   :  { %v411_v54 = vpop.f32.mrf.mxu1 }
 0x78b   :  { %v415_v55 = vadd.f32 %v411_v54, %v89_v53 }
 0x78d   :  { %996 = vtanh.f32 %v415_v55  ;;  %v904_v58 = vmul.f32 -1.442695, %v415_v55 }
 0x78f   :  { %998 = vpow2.f32 %v904_v58 }
 0x792   :  { %v413_v56 = vpop.f32.mrf.mxu1 }
 0x793   :  { %v997_v57 = vpop.eup %996  ;;  %v960_v56 = vld [vmem:[%s1252_s2] sm:$0xff] }
 0x794   :  { %442 = vrot.lane.b32.xlu0 %v997_v57, %s1063_s24  ;;  %587 = vmatpush.bf16.msrb.mxu3 %v960_v56 }
 0x795   :  { %v999_v59 = vpop.eup %998 }
 0x796   :  { %v419_v60 = vadd.f32 1.0, %v999_v59 }
 0x798   :  { %1000 = vrcp.f32 %v419_v60  ;;  %v431_v2 = vand.u32 2147483648, %v419_v60  ;;  %vm425_vm15 = vweird.f32 %v419_v60  ;;  %v429_v3 = vand.u32 2147483647, %v419_v60 }
 0x79a   :  { %v432_v5 = vor.u32 1.1754944e-38, %v431_v2  ;;  %vm430_vm3 = vcmp.eq.f32.partialorder %v429_v3, 8.507059e+37 }
 0x79e   :  { %v1001_v61 = vpop.eup %1000 }
 0x79f   :  { %v421_v62 = vmul.f32 %v1001_v61, %v419_v60  ;;  %vm426_vm14 = vweird.f32 %v1001_v61  ;;  %v93_v60 = vpop.f32.mrf.mxu0 }
 0x7a0   :  { %vm427_vm2 = vmor %vm425_vm15, %vm426_vm14 }
 0x7a1   :  { %v422_v63 = vsub.f32 1.0, %v421_v62 }
 0x7a3   :  { %v423_v0 = vmul.f32 %v1001_v61, %v422_v63 }
 0x7a5   :  { %v424_v1 = vadd.f32 %v1001_v61, %v423_v0 }
 0x7a7   :  { %v428_v4 = vsel %vm427_vm2, %v1001_v61, %v424_v1  ;;  %v94_v61 = vadd.f32 %v1111_v7, %v93_v60  ;;  %v965_v60 = vld [vmem:[%s1252_s2 + $0x8] sm:$0xff] }
 0x7a8   :  { %v433_v8 = vsel %vm430_vm3, %v432_v5, %v428_v4  ;;  %764 = vmatpush.bf16.msra.mxu2 %v965_v60 }
 0x7a9   :  { %v440_v11 = vmul.f32 %v438_v10, %v433_v8 }
 0x806   :  { %v443_v6 = vpop.permute.xlu0 %442 }
 0x807   :  { %v445_v9 = vmul.f32 %v443_v6, %v433_v8 }
 0x809   :  { %447 = vrot.lane.b32.xlu2 %v445_v9, %s1064_s25 }
 0x863   :  { %v448_v12 = vpop.permute.xlu2 %447 }
 0x864   :  { %v450_v13 = vadd.f32 %v448_v12, %v440_v11 }
 0x866   :  { %1002 = vtanh.f32 %v450_v13  ;;  %458 = vrot.lane.b32.xlu2 %v450_v13, %s1065_s3 }
 0x86c   :  { %v1003_v14 = vpop.eup %1002 }
 0x86d   :  { %453 = vrot.lane.b32.xlu0 %v1003_v14, %s1063_s24 }
 0x8c0   :  { %v459_v15 = vpop.permute.xlu2 %458 }
 0x8c1   :  { %461 = vst.msk [vmem:[#allocation4] sm:$0xff] %vm109_vm0, %v459_v15 }
 0x8c8   :  { %v470_v19 = vld [vmem:[#allocation4] sm:$0xff] }
 0x8df   :  { %v454_v17 = vpop.permute.xlu0 %453 }
 0x8e0   :  { %v456_v18 = vmul.f32 %v454_v17, %v433_v8 }
 0x8e2   :  { %463 = vrot.lane.b32.xlu1 %v456_v18, %s1064_s25 }
 0x8ea   :  { %526 = vrot.lane.b32.xlu1 %v470_v19, %s1064_s25 }
 0x954   :  { %v464_v22 = vpop.permute.xlu1 %463 }
 0x955   :  { %466 = vst.msk [vmem:[#allocation3] sm:$0xff] %vm109_vm0, %v464_v22 }
 0x95c   :  { %v469_v23 = vld [vmem:[#allocation3] sm:$0xff]  ;;  %v527_v46 = vpop.permute.xlu1 %526 }
 0x95d   :  { %v471_v24 = vpack.c.bf16 %v469_v23, %v469_v23 }
 0x95f   :  { %913 = vmatmul.msk.bf16.vlgmr.msrb.gmra.mxu2 %vm109_vm0, %v471_v24  ;;  %v963_v24 = vld [vmem:[%s1252_s2 + $0x8] sm:$0xff] }
 0x960   :  { %675 = vmatpush.bf16.msra.mxu1 %v963_v24 }
 0x9e2   :  { %v500_v27 = vpop.f32.mrf.mxu2 }
 0x9e3   :  { %v504_v28 = vadd.f32 %v500_v27, %v92_v26 }
 0x9e5   :  { %1004 = vtanh.f32 %v504_v28  ;;  %v914_v31 = vmul.f32 -1.442695, %v504_v28  ;;  %v948_v28 = vld [vmem:[%s1250_s0 + $0x18] sm:$0xff] }
 0x9e6   :  { %864 = vmatmul.msk.bf16.gmra.mxu0 %vm59_vm1, %v948_v28 }
 0x9e7   :  { %1006 = vpow2.f32 %v914_v31 }
 0x9ea   :  { %v502_v29 = vpop.f32.mrf.mxu2 }
 0x9eb   :  { %v1005_v30 = vpop.eup %1004  ;;  %v962_v29 = vld [vmem:[%s1252_s2] sm:$0xff] }
 0x9ec   :  { %531 = vrot.lane.b32.xlu0 %v1005_v30, %s1063_s24  ;;  %676 = vmatpush.bf16.msra.mxu1 %v962_v29 }
 0x9ed   :  { %v1007_v32 = vpop.eup %1006 }
 0x9ee   :  { %v508_v33 = vadd.f32 1.0, %v1007_v32 }
 0x9f0   :  { %1008 = vrcp.f32 %v508_v33  ;;  %v520_v39 = vand.u32 2147483648, %v508_v33  ;;  %vm514_vm5 = vweird.f32 %v508_v33  ;;  %v518_v40 = vand.u32 2147483647, %v508_v33 }
 0x9f2   :  { %v521_v42 = vor.u32 1.1754944e-38, %v520_v39  ;;  %vm519_vm7 = vcmp.eq.f32.partialorder %v518_v40, 8.507059e+37 }
 0x9f6   :  { %v1009_v34 = vpop.eup %1008 }
 0x9f7   :  { %v510_v35 = vmul.f32 %v1009_v34, %v508_v33  ;;  %vm515_vm4 = vweird.f32 %v1009_v34 }
 0x9f8   :  { %vm516_vm6 = vmor %vm514_vm5, %vm515_vm4 }
 0x9f9   :  { %v511_v36 = vsub.f32 1.0, %v510_v35 }
 0x9fb   :  { %v512_v37 = vmul.f32 %v1009_v34, %v511_v36 }
 0x9fd   :  { %v513_v38 = vadd.f32 %v1009_v34, %v512_v37 }
 0x9ff   :  { %v517_v41 = vsel %vm516_vm6, %v1009_v34, %v513_v38 }
 0xa00   :  { %v522_v44 = vsel %vm519_vm7, %v521_v42, %v517_v41 }
 0xa01   :  { %v529_v47 = vmul.f32 %v527_v46, %v522_v44 }
 0xa5e   :  { %v532_v43 = vpop.permute.xlu0 %531 }
 0xa5f   :  { %v534_v45 = vmul.f32 %v532_v43, %v522_v44 }
 0xa61   :  { %536 = vrot.lane.b32.xlu2 %v534_v45, %s1064_s25 }
 0xa63   :  { %v96_v33 = vpop.f32.mrf.mxu0 }
 0xa64   :  { %v97_v34 = vadd.f32 %v1111_v7, %v96_v33 }
 0xabb   :  { %v537_v48 = vpop.permute.xlu2 %536 }
 0xabc   :  { %v539_v49 = vadd.f32 %v537_v48, %v529_v47 }
 0xabe   :  { %1010 = vtanh.f32 %v539_v49  ;;  %547 = vrot.lane.b32.xlu2 %v539_v49, %s1065_s3 }
 0xac4   :  { %v1011_v50 = vpop.eup %1010 }
 0xac5   :  { %542 = vrot.lane.b32.xlu0 %v1011_v50, %s1063_s24 }
 0xb18   :  { %v548_v51 = vpop.permute.xlu2 %547 }
 0xb19   :  { %550 = vst.msk [vmem:[#allocation4] sm:$0xff] %vm109_vm0, %v548_v51 }
 0xb20   :  { %v559_v55 = vld [vmem:[#allocation4] sm:$0xff] }
 0xb37   :  { %v543_v53 = vpop.permute.xlu0 %542 }
 0xb38   :  { %v545_v54 = vmul.f32 %v543_v53, %v522_v44 }
 0xb3a   :  { %552 = vrot.lane.b32.xlu1 %v545_v54, %s1064_s25 }
 0xb42   :  { %615 = vrot.lane.b32.xlu1 %v559_v55, %s1064_s25 }
 0xbac   :  { %v553_v57 = vpop.permute.xlu1 %552 }
 0xbad   :  { %555 = vst.msk [vmem:[#allocation3] sm:$0xff] %vm109_vm0, %v553_v57 }
 0xbb4   :  { %v558_v58 = vld [vmem:[#allocation3] sm:$0xff]  ;;  %v616_v18 = vpop.permute.xlu1 %615 }
 0xbb5   :  { %v560_v59 = vpack.c.bf16 %v558_v58, %v558_v58 }
 0xbb7   :  { %923 = vmatmul.msk.bf16.vlgmr.msrb.gmra.mxu3 %vm109_vm0, %v560_v59 }
 0xc3a   :  { %v589_v62 = vpop.f32.mrf.mxu3 }
 0xc3b   :  { %v593_v63 = vadd.f32 %v589_v62, %v94_v61 }
 0xc3d   :  { %1012 = vtanh.f32 %v593_v63  ;;  %v924_v2 = vmul.f32 -1.442695, %v593_v63 }
 0xc3f   :  { %1014 = vpow2.f32 %v924_v2 }
 0xc42   :  { %v591_v0 = vpop.f32.mrf.mxu3 }
 0xc43   :  { %v1013_v1 = vpop.eup %1012  ;;  %v964_v0 = vld [vmem:[%s1252_s2] sm:$0xff]  ;;  %s1066_s2 = smov [#allocation5]  }
 0xc44   :  { %620 = vrot.lane.b32.xlu0 %v1013_v1, %s1063_s24  ;;  %765 = vmatpush.bf16.msra.mxu2 %v964_v0  ;;  %s830_s8 = sshll.u32 %s1066_s2, 4  ;;  %s831_s8 = int_to_ptr.vmem [resolvable:$true] %s830_s8 }
 0xc45   :  { %v1015_v3 = vpop.eup %1014 }
 0xc46   :  { %v597_v4 = vadd.f32 1.0, %v1015_v3 }
 0xc48   :  { %1016 = vrcp.f32 %v597_v4  ;;  %v609_v11 = vand.u32 2147483648, %v597_v4  ;;  %vm603_vm9 = vweird.f32 %v597_v4  ;;  %v607_v12 = vand.u32 2147483647, %v597_v4 }
 0xc4a   :  { %v610_v14 = vor.u32 1.1754944e-38, %v609_v11  ;;  %vm608_vm11 = vcmp.eq.f32.partialorder %v607_v12, 8.507059e+37 }
 0xc4e   :  { %v1017_v5 = vpop.eup %1016 }
 0xc4f   :  { %v599_v6 = vmul.f32 %v1017_v5, %v597_v4  ;;  %vm604_vm8 = vweird.f32 %v1017_v5  ;;  %v98_v4 = vpop.f32.mrf.mxu0 }
 0xc50   :  { %vm605_vm10 = vmor %vm603_vm9, %vm604_vm8 }
 0xc51   :  { %v600_v8 = vsub.f32 1.0, %v599_v6 }
 0xc53   :  { %v601_v9 = vmul.f32 %v1017_v5, %v600_v8 }
 0xc55   :  { %v602_v10 = vadd.f32 %v1017_v5, %v601_v9 }
 0xc57   :  { %v606_v13 = vsel %vm605_vm10, %v1017_v5, %v602_v10  ;;  %v99_v5 = vadd.f32 %v1111_v7, %v98_v4 }
 0xc58   :  { %v611_v16 = vsel %vm608_vm11, %v610_v14, %v606_v13 }
 0xc59   :  { %v618_v19 = vmul.f32 %v616_v18, %v611_v16 }
 0xcb6   :  { %v621_v15 = vpop.permute.xlu0 %620 }
 0xcb7   :  { %v623_v17 = vmul.f32 %v621_v15, %v611_v16 }
 0xcb9   :  { %625 = vrot.lane.b32.xlu2 %v623_v17, %s1064_s25 }
 0xd13   :  { %v626_v20 = vpop.permute.xlu2 %625 }
 0xd14   :  { %v628_v21 = vadd.f32 %v626_v20, %v618_v19 }
 0xd16   :  { %1018 = vtanh.f32 %v628_v21  ;;  %636 = vrot.lane.b32.xlu2 %v628_v21, %s1065_s3 }
 0xd1c   :  { %v1019_v22 = vpop.eup %1018 }
 0xd1d   :  { %631 = vrot.lane.b32.xlu0 %v1019_v22, %s1063_s24 }
 0xd70   :  { %v637_v23 = vpop.permute.xlu2 %636 }
 0xd71   :  { %639 = vst.msk [vmem:[#allocation4] sm:$0xff] %vm109_vm0, %v637_v23 }
 0xd78   :  { %v648_v27 = vld [vmem:[#allocation4] sm:$0xff] }
 0xd8f   :  { %v632_v25 = vpop.permute.xlu0 %631 }
 0xd90   :  { %v634_v26 = vmul.f32 %v632_v25, %v611_v16 }
 0xd92   :  { %641 = vrot.lane.b32.xlu1 %v634_v26, %s1064_s25 }
 0xd9a   :  { %704 = vrot.lane.b32.xlu1 %v648_v27, %s1064_s25 }
 0xe04   :  { %v642_v30 = vpop.permute.xlu1 %641 }
 0xe05   :  { %644 = vst.msk [vmem:[#allocation3] sm:$0xff] %vm109_vm0, %v642_v30 }
 0xe0c   :  { %v647_v31 = vld [vmem:[#allocation3] sm:$0xff]  ;;  %v705_v54 = vpop.permute.xlu1 %704 }
 0xe0d   :  { %v649_v32 = vpack.c.bf16 %v647_v31, %v647_v31 }
 0xe0f   :  { %933 = vmatmul.msk.bf16.vlgmr.msra.gmra.mxu1 %vm109_vm0, %v649_v32 }
 0xe8c   :  { %v678_v35 = vpop.f32.mrf.mxu1 }
 0xe8d   :  { %v682_v36 = vadd.f32 %v678_v35, %v97_v34 }
 0xe8f   :  { %1020 = vtanh.f32 %v682_v36  ;;  %v934_v39 = vmul.f32 -1.442695, %v682_v36 }
 0xe91   :  { %1022 = vpow2.f32 %v934_v39 }
 0xe94   :  { %v680_v37 = vpop.f32.mrf.mxu1 }
 0xe95   :  { %v1021_v38 = vpop.eup %1020 }
 0xe96   :  { %709 = vrot.lane.b32.xlu0 %v1021_v38, %s1063_s24 }
 0xe97   :  { %v1023_v40 = vpop.eup %1022 }
 0xe98   :  { %v686_v41 = vadd.f32 1.0, %v1023_v40 }
 0xe9a   :  { %1024 = vrcp.f32 %v686_v41  ;;  %v698_v47 = vand.u32 2147483648, %v686_v41  ;;  %vm692_vm12 = vweird.f32 %v686_v41  ;;  %v696_v48 = vand.u32 2147483647, %v686_v41 }
 0xe9c   :  { %v699_v50 = vor.u32 1.1754944e-38, %v698_v47  ;;  %vm697_vm14 = vcmp.eq.f32.partialorder %v696_v48, 8.507059e+37 }
 0xea0   :  { %v1025_v42 = vpop.eup %1024 }
 0xea1   :  { %v688_v43 = vmul.f32 %v1025_v42, %v686_v41  ;;  %vm693_vm1 = vweird.f32 %v1025_v42 }
 0xea2   :  { %vm694_vm13 = vmor %vm692_vm12, %vm693_vm1 }
 0xea3   :  { %v689_v44 = vsub.f32 1.0, %v688_v43 }
 0xea5   :  { %v690_v45 = vmul.f32 %v1025_v42, %v689_v44 }
 0xea7   :  { %v691_v46 = vadd.f32 %v1025_v42, %v690_v45 }
 0xea9   :  { %v695_v49 = vsel %vm694_vm13, %v1025_v42, %v691_v46 }
 0xeaa   :  { %v700_v52 = vsel %vm697_vm14, %v699_v50, %v695_v49 }
 0xeab   :  { %v707_v55 = vmul.f32 %v705_v54, %v700_v52 }
 0xf08   :  { %v710_v51 = vpop.permute.xlu0 %709 }
 0xf09   :  { %v712_v53 = vmul.f32 %v710_v51, %v700_v52 }
 0xf0b   :  { %714 = vrot.lane.b32.xlu2 %v712_v53, %s1064_s25 }
 0xf65   :  { %v715_v56 = vpop.permute.xlu2 %714 }
 0xf66   :  { %v717_v57 = vadd.f32 %v715_v56, %v707_v55 }
 0xf68   :  { %1026 = vtanh.f32 %v717_v57  ;;  %725 = vrot.lane.b32.xlu2 %v717_v57, %s1065_s3 }
 0xf6e   :  { %v1027_v58 = vpop.eup %1026 }
 0xf6f   :  { %720 = vrot.lane.b32.xlu0 %v1027_v58, %s1063_s24 }
 0xfc2   :  { %v726_v59 = vpop.permute.xlu2 %725 }
 0xfc3   :  { %728 = vst.msk [vmem:[#allocation4] sm:$0xff] %vm109_vm0, %v726_v59 }
 0xfca   :  { %v737_v63 = vld [vmem:[#allocation4] sm:$0xff] }
 0xfe1   :  { %v721_v61 = vpop.permute.xlu0 %720 }
 0xfe2   :  { %v723_v62 = vmul.f32 %v721_v61, %v700_v52 }
 0xfe4   :  { %730 = vrot.lane.b32.xlu1 %v723_v62, %s1064_s25 }
 0xfec   :  { %793 = vrot.lane.b32.xlu1 %v737_v63, %s1064_s25 }
0x1056   :  { %v731_v1 = vpop.permute.xlu1 %730 }
0x1057   :  { %733 = vst.msk [vmem:[#allocation3] sm:$0xff] %vm109_vm0, %v731_v1 }
0x105e   :  { %v736_v2 = vld [vmem:[#allocation3] sm:$0xff]  ;;  %v794_v25 = vpop.permute.xlu1 %793 }
0x105f   :  { %v738_v3 = vpack.c.bf16 %v736_v2, %v736_v2 }
0x1061   :  { %943 = vmatmul.msk.bf16.vlgmr.msra.gmra.mxu2 %vm109_vm0, %v738_v3 }
0x10e4   :  { %v767_v6 = vpop.f32.mrf.mxu2 }
0x10e5   :  { %v771_v8 = vadd.f32 %v767_v6, %v99_v5 }
0x10e7   :  { %1028 = vtanh.f32 %v771_v8  ;;  %v944_v11 = vmul.f32 -1.442695, %v771_v8 }
0x10e9   :  { %1030 = vpow2.f32 %v944_v11 }
0x10ec   :  { %v769_v9 = vpop.f32.mrf.mxu2 }
0x10ed   :  { %v1029_v10 = vpop.eup %1028 }
0x10ee   :  { %798 = vrot.lane.b32.xlu0 %v1029_v10, %s1063_s24 }
0x10ef   :  { %v1031_v12 = vpop.eup %1030 }
0x10f0   :  { %v775_v13 = vadd.f32 1.0, %v1031_v12 }
0x10f2   :  { %1032 = vrcp.f32 %v775_v13  ;;  %v787_v19 = vand.u32 2147483648, %v775_v13  ;;  %vm781_vm2 = vweird.f32 %v775_v13  ;;  %v785_v7 = vand.u32 2147483647, %v775_v13 }
0x10f4   :  { %v788_v21 = vor.u32 1.1754944e-38, %v787_v19  ;;  %vm786_vm4 = vcmp.eq.f32.partialorder %v785_v7, 8.507059e+37 }
0x10f8   :  { %v1033_v14 = vpop.eup %1032 }
0x10f9   :  { %v777_v15 = vmul.f32 %v1033_v14, %v775_v13  ;;  %vm782_vm15 = vweird.f32 %v1033_v14 }
0x10fa   :  { %vm783_vm3 = vmor %vm781_vm2, %vm782_vm15 }
0x10fb   :  { %v778_v16 = vsub.f32 1.0, %v777_v15 }
0x10fd   :  { %v779_v17 = vmul.f32 %v1033_v14, %v778_v16 }
0x10ff   :  { %v780_v18 = vadd.f32 %v1033_v14, %v779_v17 }
0x1101   :  { %v784_v20 = vsel %vm783_vm3, %v1033_v14, %v780_v18 }
0x1102   :  { %v789_v23 = vsel %vm786_vm4, %v788_v21, %v784_v20 }
0x1103   :  { %v796_v26 = vmul.f32 %v794_v25, %v789_v23 }
0x1160   :  { %v799_v22 = vpop.permute.xlu0 %798 }
0x1161   :  { %v801_v24 = vmul.f32 %v799_v22, %v789_v23 }
0x1163   :  { %803 = vrot.lane.b32.xlu2 %v801_v24, %s1064_s25 }
0x11bd   :  { %v804_v27 = vpop.permute.xlu2 %803 }
0x11be   :  { %v806_v28 = vadd.f32 %v804_v27, %v796_v26 }
0x11c0   :  { %1034 = vtanh.f32 %v806_v28  ;;  %814 = vrot.lane.b32.xlu2 %v806_v28, %s1065_s3 }
0x11c6   :  { %v1035_v29 = vpop.eup %1034 }
0x11c7   :  { %809 = vrot.lane.b32.xlu0 %v1035_v29, %s1063_s24 }
0x121a   :  { %v815_v30 = vpop.permute.xlu2 %814 }
0x121b   :  { %817 = vst.msk [vmem:[#allocation4] sm:$0xff] %vm109_vm0, %v815_v30 }
0x1239   :  { %v810_v31 = vpop.permute.xlu0 %809 }
0x123a   :  { %v812_v32 = vmul.f32 %v810_v31, %v789_v23 }
0x123c   :  { %819 = vrot.lane.b32.xlu1 %v812_v32, %s1064_s25 }
0x12ae   :  { %v820_v33 = vpop.permute.xlu1 %819 }
0x12af   :  { %822 = vst.msk [vmem:[#allocation3] sm:$0xff] %vm109_vm0, %v820_v33 }
0x12b6   :  { %v823_v34 = vld [vmem:[#allocation3] sm:$0xff] }
0x12b7   :  { %824 = vst.msk [vmem:[#allocation5] sm:$0xff] %vm109_vm0, %v823_v34 }
0x12b8   :  { %835 = dma.vmem_to_hbm [thread:$0]  %s831_s8, 128, %s833_s11, [#allocation6]  }
0x12b9   :  { %1060 = dma.done.wait [#allocation6], 128  }
0x12ba   :  { %1061 = vsyncadd [#allocation6], 4294967168 }
0x12bb   :  { %840 = vsyncpa [#allocation6], 1 }

</bundles_post_ra>
